<compile_context>
chip_gen: v5e
topology: v5e:2x2
jax: 0.10.0
libtpu: 0.0.40
codegen_flags: <defaults>
</compile_context>

<pallas_src>
import functools

import jax
import jax.numpy as jnp
from jax import lax
from jax.experimental import pallas as pl
from jax.experimental.pallas import tpu as pltpu


_VMEM_LIMIT = 48 * 1024 * 1024    # leave headroom on v7x (64 MiB/TC); raises v5e's 16 MiB default
_VMEM_BUDGET = 36 * 1024 * 1024   # cap for the per-step double-buffered working set
_TM_CAP = 1024                    # row-tile cap
_TK_CAP = 2048                    # contraction-tile cap


# --------------------------------------------------------------------------- #
# Kernel: out_rows = dinv_row * ( (A+I)_tile @ (x_tile @ W) ) + b  [relu/prescale]
# --------------------------------------------------------------------------- #
def _gcn_prop_kernel(a_ref, xs_ref, w_ref, b_ref, dinv_ref, o_ref, acc_ref,
                     *, relu, prescale_out):
    k = pl.program_id(1)

    @pl.when(k == 0)
    def _():
        acc_ref[...] = jnp.zeros_like(acc_ref)

    # Fused feature transform (tiny vs the A matmul: ratio ~128/tm, free when
    # memory bound).  A tile is binary {0,1} int8 -> exact in any float dtype;
    # the D^{-1/2} scaling is folded into xs (columns) and the finalize (rows).
    m = jnp.dot(xs_ref[...], w_ref[...], preferred_element_type=jnp.float32)
    m = m.astype(xs_ref.dtype)
    a = a_ref[...].astype(m.dtype)
    acc_ref[...] += jnp.dot(a, m, preferred_element_type=jnp.float32)

    @pl.when(k == pl.num_programs(1) - 1)
    def _():
        dinv = dinv_ref[...]                      # (tm, 1) f32 row scaling
        out = dinv * acc_ref[...] + b_ref[...].astype(jnp.float32)
        if relu:
            out = jnp.maximum(out, 0.0)
        if prescale_out:
            # pre-apply the next layer's D^{-1/2} column scaling to this output
            out = dinv * out
        o_ref[...] = out.astype(o_ref.dtype)


# --------------------------------------------------------------------------- #
# pallas_call wrapper
# --------------------------------------------------------------------------- #
def _gcn_propagate(a_bin, xs, w, b, dinv, *, relu, prescale_out, out_dtype, tm, tk):
    n_pad = a_bin.shape[0]
    f_pad = xs.shape[1]
    h_pad = w.shape[1]
    grid = (n_pad // tm, n_pad // tk)

    flops = 2 * n_pad * n_pad * h_pad + 2 * n_pad * f_pad * h_pad * grid[0]
    bytes_accessed = (
        a_bin.size * a_bin.dtype.itemsize
        + xs.size * xs.dtype.itemsize * grid[0]        # xs re-streamed per row tile
        + w.size * w.dtype.itemsize
        + n_pad * h_pad * jnp.dtype(out_dtype).itemsize
        + dinv.size * 4
        + b.size * 4
    )

    kernel = functools.partial(_gcn_prop_kernel, relu=relu, prescale_out=prescale_out)
    return pl.pallas_call(
        kernel,
        out_shape=jax.ShapeDtypeStruct((n_pad, h_pad), out_dtype),
        grid_spec=pltpu.PrefetchScalarGridSpec(
            num_scalar_prefetch=0,
            grid=grid,
            in_specs=[
                pl.BlockSpec((tm, tk), lambda i, k: (i, k)),         # binary (A+I) tile
                pl.BlockSpec((tk, f_pad), lambda i, k: (k, 0)),      # pre-scaled features
                pl.BlockSpec((f_pad, h_pad), lambda i, k: (0, 0)),   # resident W
                pl.BlockSpec((1, h_pad), lambda i, k: (0, 0)),       # bias
                pl.BlockSpec((tm, 1), lambda i, k: (i, 0)),          # D^{-1/2} row tile
            ],
            out_specs=pl.BlockSpec((tm, h_pad), lambda i, k: (i, 0)),
            scratch_shapes=[pltpu.VMEM((tm, h_pad), jnp.float32)],
        ),
        compiler_params=pltpu.CompilerParams(
            dimension_semantics=("parallel", "arbitrary"),
            vmem_limit_bytes=_VMEM_LIMIT,
        ),
        cost_estimate=pl.CostEstimate(
            flops=flops, transcendentals=0, bytes_accessed=bytes_accessed
        ),
    )(a_bin, xs, w, b, dinv)


# --------------------------------------------------------------------------- #
# Tile / padding selection
# --------------------------------------------------------------------------- #
def _round_up(x, m):
    return (x + m - 1) // m * m


def _choose_tiles(n, *, f_pad, h_pad, m_bytes, out_bytes,
                  tm_cap=_TM_CAP, tk_cap=_TK_CAP,
                  vmem_budget=_VMEM_BUDGET, max_pad_frac=0.06):
    """Pick (n_pad, tm, tk) with n_pad % tm == n_pad % tk == 0 (tiles are built
    from divisors of n_pad/128), padding limited to a few percent of N, the
    per-step working set under the VMEM budget, and (when possible) at least two
    row tiles so the parallel grid axis feeds both TensorCores on v7x."""
    q0 = -(-n // 128)
    slack = int(q0 * max_pad_frac)
    best = None
    for q in range(q0, q0 + slack + 1):
        divs = [d for d in range(1, q + 1) if q % d == 0]
        for dm in divs:
            tm = 128 * dm
            if tm > tm_cap:
                continue
            if q >= 2 and q // dm < 2:      # keep >= 2 row tiles for megacore
                continue
            for dk in divs:
                tk = 128 * dk
                if tk > tk_cap:
                    continue
                ws = (2 * tm * tk                      # int8 A tiles (double-buffered)
                      + tm * tk * m_bytes              # converted A operand temp
                      + 2 * tk * f_pad * m_bytes       # xs tiles
                      + 2 * tm * h_pad * out_bytes     # output tiles
                      + tm * h_pad * 4                 # f32 accumulator
                      + f_pad * h_pad * m_bytes        # resident W
                      + (2 << 20))                     # misc headroom
                if ws > vmem_budget:
                    continue
                key = (dm * dk, dm, -q)   # fewest steps, then fewest xs re-streams,
                if best is None or key > best[0]:      # then least padding
                    best = (key, 128 * q, tm, tk)
    if best is None:
        return 128 * q0, 128, 128
    return best[1], best[2], best[3]


# --------------------------------------------------------------------------- #
# Model
# --------------------------------------------------------------------------- #
def _pad2(a, rows, cols):
    return jnp.pad(a, ((0, rows - a.shape[0]), (0, cols - a.shape[1])))


def gcn_normalized_adj(edge_index, num_nodes, dtype=jnp.float32):
    """Dense D^{-1/2}(A+I)D^{-1/2} matching PyG GCNConv (reference path only)."""
    row, col = edge_index[0], edge_index[1]
    loop = jnp.arange(num_nodes, dtype=edge_index.dtype)
    row = jnp.concatenate([row, loop])
    col = jnp.concatenate([col, loop])
    a = jnp.zeros((num_nodes, num_nodes), dtype).at[col, row].add(1.0)
    deg = a.sum(axis=1)
    dinv = jnp.where(deg > 0, lax.rsqrt(deg), 0.0)
    return dinv[:, None] * a * dinv[None, :]


def discriminator_forward(x, edge_index, params, *, compute_dtype=jnp.bfloat16):
    """x: [N, F] float32, edge_index: [2, E] int32 -> z: [N, HIDDEN] float32."""
    n, f = x.shape
    hidden = params["w2"].shape[1]

    f_pad = _round_up(f, 128)
    h_pad = _round_up(hidden, 128)
    cbytes = jnp.dtype(compute_dtype).itemsize
    n_pad, tm, tk = _choose_tiles(n, f_pad=f_pad, h_pad=h_pad,
                                  m_bytes=cbytes, out_bytes=4)

    # Degrees / D^{-1/2} from the edge list (O(E); no dense pass over A).
    row, col = edge_index[0], edge_index[1]
    loop = jnp.arange(n, dtype=edge_index.dtype)
    row_sl = jnp.concatenate([row, loop])
    col_sl = jnp.concatenate([col, loop])
    deg = jnp.zeros((n,), jnp.float32).at[col_sl].add(1.0)
    dinv = jnp.where(deg > 0, lax.rsqrt(deg), 0.0)
    dinv_pad = jnp.zeros((n_pad, 1), jnp.float32).at[:n, 0].set(dinv)

    # Binary (A+I) built directly at padded shape in int8 (single fused scatter;
    # entries are exact, normalization applied in f32 inside the kernel).
    a_bin = jnp.zeros((n_pad, n_pad), jnp.int8).at[col_sl, row_sl].add(
        jnp.ones(row_sl.shape, jnp.int8))

    # Features pre-scaled by D^{-1/2} (column scaling folded out of A), padded.
    x_scaled = jnp.zeros((n_pad, f_pad), compute_dtype).at[:n, :f].set(
        (dinv[:, None] * x).astype(compute_dtype))

    w1 = _pad2(params["w1"], f_pad, h_pad).astype(compute_dtype)
    w2 = _pad2(params["w2"], h_pad, h_pad).astype(compute_dtype)
    b1 = _pad2(params["b1"], 1, h_pad).astype(jnp.float32)
    b2 = _pad2(params["b2"], 1, h_pad).astype(jnp.float32)

    # Layer 1: h1s = D^{-1/2} * relu(A_hat @ (x @ W1) + b1)   (prescaled for layer 2)
    h1s = _gcn_propagate(a_bin, x_scaled, w1, b1, dinv_pad,
                         relu=True, prescale_out=True,
                         out_dtype=compute_dtype, tm=tm, tk=tk)
    # Layer 2: z = A_hat @ (h1 @ W2) + b2
    z = _gcn_propagate(a_bin, h1s, w2, b2, dinv_pad,
                       relu=False, prescale_out=False,
                       out_dtype=jnp.float32, tm=tm, tk=tk)

    return z[:n, :hidden]


def init_params(key, num_features, hidden):
    """GCNConv: glorot weights, zero bias (deterministic synthetic init)."""
    k1, k2 = jax.random.split(key)

    def glorot(k, shape):
        limit = (6.0 / (shape[0] + shape[1])) ** 0.5
        return jax.random.uniform(k, shape, jnp.float32, -limit, limit)

    return {
        "w1": glorot(k1, (num_features, hidden)),
        "b1": jnp.zeros((1, hidden), jnp.float32),
        "w2": glorot(k2, (hidden, hidden)),
        "b2": jnp.zeros((1, hidden), jnp.float32),
    }


def _reference_forward(x, edge_index, params):
    a_hat = gcn_normalized_adj(edge_index, x.shape[0], x.dtype)
    h = jnp.maximum(a_hat @ (x @ params["w1"]) + params["b1"], 0.0)
    return a_hat @ (h @ params["w2"]) + params["b2"]


if __name__ == "__main__":
    N, F, HIDDEN = 8, 16, 32

    key = jax.random.PRNGKey(0)
    kx, kp = jax.random.split(key)

    x = jax.random.normal(kx, (N, F), jnp.float32)

    # Deterministic symmetric edge set (ring graph, both directions).
    src = jnp.arange(N, dtype=jnp.int32)
    dst = (src + 1) % N
    edge_index = jnp.stack(
        [jnp.concatenate([src, dst]), jnp.concatenate([dst, src])], axis=0
    )  # [2, 16]

    params = init_params(kp, F, HIDDEN)
    z_ref = _reference_forward(x, edge_index, params)

    # Exactness check: f32 compute path (adjacency is exact binary int8).
    z_f32 = discriminator_forward(x, edge_index, params, compute_dtype=jnp.float32)
    jax.block_until_ready(z_f32)
    assert z_f32.shape == (N, HIDDEN)
    assert jnp.allclose(z_f32, z_ref, atol=1e-5, rtol=1e-5)

    # Default perf path: bf16 operands, f32 accumulation (looser tolerance).
    z = discriminator_forward(x, edge_index, params)
    jax.block_until_ready(z)
    assert z.shape == (N, HIDDEN)
    assert jnp.allclose(z, z_ref, atol=5e-2, rtol=5e-2)

    print("KERNEL_OK")
</pallas_src>

<mosaic_0001>
module attributes {stable_mosaic.version = 11 : i64} {
  func.func @_gcn_prop_kernel(%arg0: i32, %arg1: i32, %arg2: memref<128x128xi8, #tpu.memory_space<vmem>>, %arg3: memref<128x128xf32, #tpu.memory_space<vmem>>, %arg4: memref<128x128xf32, #tpu.memory_space<vmem>>, %arg5: memref<1x128xf32, #tpu.memory_space<vmem>>, %arg6: memref<128x1xf32, #tpu.memory_space<vmem>>, %arg7: memref<128x128xf32, #tpu.memory_space<vmem>>, %arg8: memref<128x128xf32, #tpu.memory_space<vmem>>) attributes {dimension_semantics = [#tpu.dimension_semantics<parallel>, #tpu.dimension_semantics<arbitrary>], iteration_bounds = array<i64: 1, 1>, scalar_prefetch = 0 : i64, scratch_operands = 1 : i64, tpu.core_type = #tpu.core_type<tc>, window_params = [{transform_indices = @transform_0, window_bounds = array<i64: 128, 128>}, {transform_indices = @transform_1, window_bounds = array<i64: 128, 128>}, {pipeline_mode = #tpu.pipeline_mode<synchronous>, transform_indices = @transform_2, window_bounds = array<i64: 128, 128>}, {pipeline_mode = #tpu.pipeline_mode<synchronous>, transform_indices = @transform_3, window_bounds = array<i64: 1, 128>}, {transform_indices = @transform_4, window_bounds = array<i64: 128, 1>}, {transform_indices = @transform_5, window_bounds = array<i64: 128, 128>}]} {
    %c0_i32 = arith.constant 0 : i32
    %0 = arith.cmpi eq, %arg1, %c0_i32 : i32
    %1 = arith.extui %0 : i1 to i32
    %c0_i32_0 = arith.constant 0 : i32
    %2 = arith.cmpi ne, %1, %c0_i32_0 : i32
    scf.if %2 {
      %cst_13 = arith.constant 0.000000e+00 : f32
      %15 = vector.broadcast %cst_13 : f32 to vector<128x128xf32>
      %c0_14 = arith.constant 0 : index
      %c0_15 = arith.constant 0 : index
      %16 = vector.load %arg8[%c0_14, %c0_15] : memref<128x128xf32, #tpu.memory_space<vmem>>, vector<128x128xf32>
      tpu.vector_store %arg8[%c0_14, %c0_15], %15 {strides = array<i32>} : memref<128x128xf32, #tpu.memory_space<vmem>>, vector<128x128xf32>,
    } else {
    }
    %c0 = arith.constant 0 : index
    %c0_1 = arith.constant 0 : index
    %3 = vector.load %arg3[%c0, %c0_1] : memref<128x128xf32, #tpu.memory_space<vmem>>, vector<128x128xf32>
    %c0_2 = arith.constant 0 : index
    %c0_3 = arith.constant 0 : index
    %4 = vector.load %arg4[%c0_2, %c0_3] : memref<128x128xf32, #tpu.memory_space<vmem>>, vector<128x128xf32>
    %cst = arith.constant dense<0.000000e+00> : vector<128x128xf32>
    %5 = tpu.matmul %3, %4, %cst {dimension_numbers = #tpu.dot_dimension_numbers<[1], [0], [0], [1], [0, 0, 1, 1], [], []>} : vector<128x128xf32>, vector<128x128xf32>, vector<128x128xf32> -> vector<128x128xf32>
    %c0_4 = arith.constant 0 : index
    %c0_5 = arith.constant 0 : index
    %6 = vector.load %arg2[%c0_4, %c0_5] : memref<128x128xi8, #tpu.memory_space<vmem>>, vector<128x128xi8>
    %7 = arith.sitofp %6 : vector<128x128xi8> to vector<128x128xf32>
    %c0_6 = arith.constant 0 : index
    %c0_7 = arith.constant 0 : index
    %8 = vector.load %arg8[%c0_6, %c0_7] : memref<128x128xf32, #tpu.memory_space<vmem>>, vector<128x128xf32>
    %cst_8 = arith.constant dense<0.000000e+00> : vector<128x128xf32>
    %9 = tpu.matmul %7, %5, %cst_8 {dimension_numbers = #tpu.dot_dimension_numbers<[1], [0], [0], [1], [0, 0, 1, 1], [], []>} : vector<128x128xf32>, vector<128x128xf32>, vector<128x128xf32> -> vector<128x128xf32>
    %10 = arith.addf %8, %9 : vector<128x128xf32>
    %c0_9 = arith.constant 0 : index
    %c0_10 = arith.constant 0 : index
    %11 = vector.load %arg8[%c0_9, %c0_10] : memref<128x128xf32, #tpu.memory_space<vmem>>, vector<128x128xf32>
    tpu.vector_store %arg8[%c0_9, %c0_10], %10 {strides = array<i32>} : memref<128x128xf32, #tpu.memory_space<vmem>>, vector<128x128xf32>,
    %c0_i32_11 = arith.constant 0 : i32
    %12 = arith.cmpi eq, %arg1, %c0_i32_11 : i32
    %13 = arith.extui %12 : i1 to i32
    %c0_i32_12 = arith.constant 0 : i32
    %14 = arith.cmpi ne, %13, %c0_i32_12 : i32
    scf.if %14 {
      %c0_13 = arith.constant 0 : index
      %c0_14 = arith.constant 0 : index
      %15 = vector.load %arg6[%c0_13, %c0_14] : memref<128x1xf32, #tpu.memory_space<vmem>>, vector<128x1xf32>
      %c0_15 = arith.constant 0 : index
      %c0_16 = arith.constant 0 : index
      %16 = vector.load %arg8[%c0_15, %c0_16] : memref<128x128xf32, #tpu.memory_space<vmem>>, vector<128x128xf32>
      %17 = vector.broadcast %15 : vector<128x1xf32> to vector<128x128xf32>
      %18 = arith.mulf %17, %16 : vector<128x128xf32>
      %c0_17 = arith.constant 0 : index
      %c0_18 = arith.constant 0 : index
      %19 = vector.load %arg5[%c0_17, %c0_18] : memref<1x128xf32, #tpu.memory_space<vmem>>, vector<1x128xf32>
      %20 = vector.broadcast %19 : vector<1x128xf32> to vector<128x128xf32>
      %21 = arith.addf %18, %20 : vector<128x128xf32>
      %cst_19 = arith.constant 0.000000e+00 : f32
      %22 = vector.broadcast %cst_19 : f32 to vector<128x128xf32>
      %23 = arith.maximumf %21, %22 : vector<128x128xf32>
      %24 = vector.broadcast %15 : vector<128x1xf32> to vector<128x128xf32>
      %25 = arith.mulf %24, %23 : vector<128x128xf32>
      %c0_20 = arith.constant 0 : index
      %c0_21 = arith.constant 0 : index
      %26 = vector.load %arg7[%c0_20, %c0_21] : memref<128x128xf32, #tpu.memory_space<vmem>>, vector<128x128xf32>
      tpu.vector_store %arg7[%c0_20, %c0_21], %25 {strides = array<i32>} : memref<128x128xf32, #tpu.memory_space<vmem>>, vector<128x128xf32>,
    } else {
    }
    return
  }
  func.func @transform_0(%arg0: i32, %arg1: i32) -> (i32, i32) {
    %c0_i32 = arith.constant 0 : i32
    return %arg0, %arg1 : i32, i32
  }
  func.func @transform_1(%arg0: i32, %arg1: i32) -> (i32, i32) {
    %c0_i32 = arith.constant 0 : i32
    %c0_i32_0 = arith.constant 0 : i32
    return %arg1, %c0_i32 : i32, i32
  }
  func.func @transform_2(%arg0: i32, %arg1: i32) -> (i32, i32) {
    %c0_i32 = arith.constant 0 : i32
    %c0_i32_0 = arith.constant 0 : i32
    %c0_i32_1 = arith.constant 0 : i32
    return %c0_i32, %c0_i32_0 : i32, i32
  }
  func.func @transform_3(%arg0: i32, %arg1: i32) -> (i32, i32) {
    %c0_i32 = arith.constant 0 : i32
    %c0_i32_0 = arith.constant 0 : i32
    %c0_i32_1 = arith.constant 0 : i32
    return %c0_i32, %c0_i32_0 : i32, i32
  }
  func.func @transform_4(%arg0: i32, %arg1: i32) -> (i32, i32) {
    %c0_i32 = arith.constant 0 : i32
    %c0_i32_0 = arith.constant 0 : i32
    return %arg0, %c0_i32 : i32, i32
  }
  func.func @transform_5(%arg0: i32, %arg1: i32) -> (i32, i32) {
    %c0_i32 = arith.constant 0 : i32
    %c0_i32_0 = arith.constant 0 : i32
    return %arg0, %c0_i32 : i32, i32
  }
}

</mosaic_0001>

<bundles_post_ra>
// kernel: tpu_custom_call.1
= control target key start
LH: loop header
LB: loop body
LE: loop exit
PB: predicated region body
PF: predicated region fallthrough
CT: control target
= control target key end

     0   :  { %10 = vsyncpa [#allocation4], 0  ;;  %s853_s0 = inlined_call_operand.hbm [shape: s8[128,128], index: 0, kind: input, shape index: {}]   ;;  %s854_s1 = inlined_call_operand.vmem [shape: f32[128,128], index: 1, kind: input, shape index: {}]   ;;  %s855_s2 = inlined_call_operand.hbm [shape: f32[128,128], index: 2, kind: input, shape index: {}]   ;;  %s856_s3 = inlined_call_operand.vmem [shape: f32[1,128], index: 3, kind: input, shape index: {}]   ;;  %s857_s4 = inlined_call_operand.vmem [shape: f32[128,1], index: 4, kind: input, shape index: {}]   ;;  %s858_s5 = inlined_call_operand.hbm [shape: f32[128,128], index: 5, kind: output, shape index: {}]  }
   0x1   :  { %11 = vsyncpa [#allocation7], 0 }
   0x2   :  { %12 = vsyncpa [#allocation5], 0  ;;  %s17_s20 = sshll.u32 %s853_s0, 4  ;;  %s658_s21 = smov [#allocation3]   ;;  %s18_s20 = int_to_ptr.hbm [resolvable:$true] %s17_s20 }
   0x3   :  { %s19_s22 = sshll.u32 %s658_s21, 4  ;;  %s32_s25 = sshll.u32 %s855_s2, 4  ;;  %s20_s22 = int_to_ptr.vmem [resolvable:$true] %s19_s22  ;;  %s33_s25 = int_to_ptr.hbm [resolvable:$true] %s32_s25 }
   0x4   :  { %s659_s26 = smov 128   ;;  %s660_s27 = smov 8  }
   0x5   :  { %25 = dma.hbm_to_vmem [thread:$0]  %s18_s20, 512, %s20_s22, [#allocation4], %s659_s26, %s659_s26, %s660_s27  }
   0x6   :  { %s661_s28 = smov [#allocation6]  }
   0x7   :  { %s34_s29 = sshll.u32 %s661_s28, 4  ;;  %s35_s29 = int_to_ptr.vmem [resolvable:$true] %s34_s29 }
   0x8   :  { %40 = dma.hbm_to_vmem [thread:$0]  %s33_s25, 2048, %s35_s29, [#allocation7], %s659_s26, %s659_s26, %s660_s27  }
   0x9   :  { %652 = dma.done.wait [#allocation4], 512  }
   0xa   :  { %653 = vsyncadd [#allocation4], 4294966784 }
   0xb   :  { %654 = dma.done.wait [#allocation7], 2048  }
   0xc   :  { %655 = vsyncadd [#allocation7], 4294965248  ;;  %v104_v0 = vld [vmem:[#allocation6 + $0x78] sm:$0xff]  ;;  %v103_v1 = vld [vmem:[#allocation6 + $0x70] sm:$0xff]  ;;  %v662_v45 = vmov 0   ;;  %s524_s19 = sshll.u32 %s858_s5, 4  ;;  %s525_s19 = int_to_ptr.hbm [resolvable:$true] %s524_s19 }
   0xd   :  { %538 = vmatpush.msra.mxu2 %v104_v0  ;;  %105 = vmatpush.msra.mxu0 %v104_v0  ;;  %v102_v2 = vld [vmem:[#allocation6 + $0x68] sm:$0xff]  ;;  %v101_v3 = vld [vmem:[#allocation6 + $0x60] sm:$0xff]  ;;  %v100_v4 = vld [vmem:[#allocation6 + $0x58] sm:$0xff] }
   0xe   :  { %v99_v5 = vld [vmem:[#allocation6 + $0x50] sm:$0xff]  ;;  %v98_v6 = vld [vmem:[#allocation6 + $0x48] sm:$0xff]  ;;  %v97_v7 = vld [vmem:[#allocation6 + $0x40] sm:$0xff]  ;;  %576 = vset.pattern.permute.xlu0 %v662_v45  ;;  %577 = vset.pattern.permute.xlu1 %v662_v45 }
   0xf   :  { %539 = vmatpush.msra.mxu2 %v103_v1  ;;  %106 = vmatpush.msra.mxu0 %v103_v1  ;;  %v96_v8 = vld [vmem:[#allocation6 + $0x38] sm:$0xff]  ;;  %v95_v9 = vld [vmem:[#allocation6 + $0x30] sm:$0xff]  ;;  %v94_v10 = vld [vmem:[#allocation6 + $0x28] sm:$0xff] }
  0x10   :  { %v93_v11 = vld [vmem:[#allocation6 + $0x20] sm:$0xff]  ;;  %v92_v12 = vld [vmem:[#allocation6 + $0x18] sm:$0xff]  ;;  %v91_v13 = vld [vmem:[#allocation6 + $0x10] sm:$0xff]  ;;  %578 = vset.pattern.permute.xlu2 %v662_v45 }
  0x11   :  { %540 = vmatpush.msra.mxu2 %v102_v2  ;;  %107 = vmatpush.msra.mxu0 %v102_v2  ;;  %v90_v14 = vld [vmem:[#allocation6 + $0x8] sm:$0xff]  ;;  %v89_v15 = vld [vmem:[#allocation6] sm:$0xff]  ;;  %v83_v20 = vld [vmem:[%s854_s1 + $0x50] sm:$0xff] }
  0x12   :  { %v81_v16 = vld [vmem:[%s854_s1 + $0x40] sm:$0xff]  ;;  %v82_v18 = vld [vmem:[%s854_s1 + $0x48] sm:$0xff]  ;;  %v75_v21 = vld [vmem:[%s854_s1 + $0x10] sm:$0xff] }
  0x13   :  { %541 = vmatpush.msra.mxu2 %v101_v3  ;;  %108 = vmatpush.msra.mxu0 %v101_v3  ;;  %v73_v17 = vld [vmem:[%s854_s1] sm:$0xff]  ;;  %v74_v19 = vld [vmem:[%s854_s1 + $0x8] sm:$0xff]  ;;  %v84_v22 = vld [vmem:[%s854_s1 + $0x58] sm:$0xff] }
  0x14   :  { %v76_v23 = vld [vmem:[%s854_s1 + $0x18] sm:$0xff]  ;;  %v85_v24 = vld [vmem:[%s854_s1 + $0x60] sm:$0xff]  ;;  %v86_v26 = vld [vmem:[%s854_s1 + $0x68] sm:$0xff] }
  0x15   :  { %542 = vmatpush.msra.mxu2 %v100_v4  ;;  %109 = vmatpush.msra.mxu0 %v100_v4  ;;  %v77_v25 = vld [vmem:[%s854_s1 + $0x20] sm:$0xff]  ;;  %v78_v27 = vld [vmem:[%s854_s1 + $0x28] sm:$0xff]  ;;  %v87_v28 = vld [vmem:[%s854_s1 + $0x70] sm:$0xff] }
  0x16   :  { %v79_v29 = vld [vmem:[%s854_s1 + $0x30] sm:$0xff]  ;;  %v88_v30 = vld [vmem:[%s854_s1 + $0x78] sm:$0xff]  ;;  %v322_v43 = vld [vmem:[%s857_s4] sm:$0xff] }
  0x17   :  { %543 = vmatpush.msra.mxu2 %v99_v5  ;;  %110 = vmatpush.msra.mxu0 %v99_v5  ;;  %v80_v31 = vld [vmem:[%s854_s1 + $0x38] sm:$0xff]  ;;  %v323_v48 = vld [vmem:[%s857_s4 + $0x8] sm:$0xff]  ;;  %v324_v50 = vld [vmem:[%s857_s4 + $0x10] sm:$0xff] }
  0x18   :  { %356 = vperm.xlu0 %576, %v322_v43   ;;  %v328_v51 = vld [vmem:[%s857_s4 + $0x30] sm:$0xff]  ;;  %366 = vperm.xlu1 %577, %v324_v50   ;;  %v325_v53 = vld [vmem:[%s857_s4 + $0x18] sm:$0xff]  ;;  %v331_v54 = vld [vmem:[%s857_s4 + $0x48] sm:$0xff] }
  0x19   :  { %544 = vmatpush.msra.mxu2 %v98_v6  ;;  %111 = vmatpush.msra.mxu0 %v98_v6  ;;  %v170_v55 = vld [vmem:[#allocation3] sm:$0xff]  ;;  %v172_v56 = vld [vmem:[#allocation3 + $0x10] sm:$0xff]  ;;  %v329_v60 = vld [vmem:[%s857_s4 + $0x38] sm:$0xff] }
  0x1a   :  { %v174_v57 = vunpack.c.0.s8 %v170_v55  ;;  %v182_v58 = vunpack.c.0.s8 %v172_v56  ;;  %v326_v59 = vld [vmem:[%s857_s4 + $0x20] sm:$0xff]  ;;  %v175_v0 = vunpack.c.1.s8 %v170_v55  ;;  %v183_v1 = vunpack.c.1.s8 %v172_v56  ;;  %v327_v2 = vld [vmem:[%s857_s4 + $0x28] sm:$0xff]  ;;  %v332_v3 = vld [vmem:[%s857_s4 + $0x50] sm:$0xff] }
  0x1b   :  { %545 = vmatpush.msra.mxu2 %v97_v7  ;;  %112 = vmatpush.msra.mxu0 %v97_v7  ;;  %v334_v61 = vld [vmem:[%s857_s4 + $0x60] sm:$0xff]  ;;  %v337_v4 = vld [vmem:[%s857_s4 + $0x78] sm:$0xff]  ;;  %v176_v7 = vunpack.c.2.s8 %v170_v55 }
  0x1c   :  { %376 = vperm.xlu2 %578, %v326_v59   ;;  %v190_v62 = vcvt.s32.f32 %v174_v57  ;;  %v198_v63 = vcvt.s32.f32 %v182_v58  ;;  %v191_v5 = vcvt.s32.f32 %v175_v0  ;;  %v199_v6 = vcvt.s32.f32 %v183_v1 }
  0x1d   :  { %546 = vmatpush.msra.mxu2 %v96_v8  ;;  %113 = vmatpush.msra.mxu0 %v96_v8  ;;  %v184_v8 = vunpack.c.2.s8 %v172_v56 }
  0x1f   :  { %547 = vmatpush.msra.mxu2 %v95_v9  ;;  %114 = vmatpush.msra.mxu0 %v95_v9  ;;  %v330_v9 = vld [vmem:[%s857_s4 + $0x40] sm:$0xff] }
  0x20   :  { %361 = vperm.xlu0 %576, %v323_v48   ;;  %371 = vperm.xlu1 %577, %v325_v53  }
  0x21   :  { %548 = vmatpush.msra.mxu2 %v94_v10  ;;  %115 = vmatpush.msra.mxu0 %v94_v10  ;;  %v335_v10 = vld [vmem:[%s857_s4 + $0x68] sm:$0xff] }
  0x23   :  { %549 = vmatpush.msra.mxu2 %v93_v11  ;;  %116 = vmatpush.msra.mxu0 %v93_v11  ;;  %v192_v11 = vcvt.s32.f32 %v176_v7 }
  0x24   :  { %381 = vperm.xlu2 %578, %v327_v2  }
  0x25   :  { %550 = vmatpush.msra.mxu2 %v92_v12  ;;  %117 = vmatpush.msra.mxu0 %v92_v12  ;;  %v200_v12 = vcvt.s32.f32 %v184_v8 }
  0x27   :  { %551 = vmatpush.msra.mxu2 %v91_v13  ;;  %118 = vmatpush.msra.mxu0 %v91_v13  ;;  %v177_v13 = vunpack.c.3.s8 %v170_v55 }
  0x28   :  { %386 = vperm.xlu0 %576, %v328_v51   ;;  %391 = vperm.xlu1 %577, %v329_v60  }
  0x29   :  { %552 = vmatpush.msra.mxu2 %v90_v14  ;;  %119 = vmatpush.msra.mxu0 %v90_v14  ;;  %v185_v14 = vunpack.c.3.s8 %v172_v56 }
  0x2b   :  { %553 = vmatpush.msra.mxu2 %v89_v15  ;;  %120 = vmatpush.msra.mxu0 %v89_v15  ;;  %v193_v15 = vcvt.s32.f32 %v177_v13 }
  0x2c   :  { %145 = vmatmul.f32.vlgmr.msra.gmra.mxu2 %v81_v16  ;;  %121 = vmatmul.f32.vlgmr.msra.gmra.mxu0 %v73_v17  ;;  %v201_v16 = vcvt.s32.f32 %v185_v14  ;;  %v171_v17 = vld [vmem:[#allocation3 + $0x8] sm:$0xff] }
  0x2d   :  { %396 = vperm.xlu2 %578, %v330_v9  }
  0x30   :  { %401 = vperm.xlu0 %576, %v331_v54   ;;  %406 = vperm.xlu1 %577, %v332_v3  }
  0x34   :  { %148 = vmatmul.f32.gmra.mxu2 %v82_v18  ;;  %124 = vmatmul.f32.gmra.mxu0 %v74_v19  ;;  %v173_v18 = vld [vmem:[#allocation3 + $0x18] sm:$0xff]  ;;  %v178_v19 = vunpack.c.0.s8 %v171_v17 }
  0x38   :  { %416 = vperm.xlu0 %576, %v334_v61   ;;  %421 = vperm.xlu1 %577, %v335_v10  }
  0x3c   :  { %151 = vmatmul.f32.gmra.mxu2 %v83_v20  ;;  %127 = vmatmul.f32.gmra.mxu0 %v75_v21  ;;  %v186_v20 = vunpack.c.0.s8 %v173_v18  ;;  %v333_v21 = vld [vmem:[%s857_s4 + $0x58] sm:$0xff] }
  0x3d   :  { %411 = vperm.xlu2 %578, %v333_v21  }
  0x40   :  { %431 = vperm.xlu0 %576, %v337_v4  }
  0x44   :  { %154 = vmatmul.f32.gmra.mxu2 %v84_v22  ;;  %130 = vmatmul.f32.gmra.mxu0 %v76_v23  ;;  %v194_v22 = vcvt.s32.f32 %v178_v19  ;;  %v202_v23 = vcvt.s32.f32 %v186_v20 }
  0x4c   :  { %157 = vmatmul.f32.gmra.mxu2 %v85_v24  ;;  %133 = vmatmul.f32.gmra.mxu0 %v77_v25  ;;  %v336_v24 = vld [vmem:[%s857_s4 + $0x70] sm:$0xff]  ;;  %v179_v25 = vunpack.c.1.s8 %v171_v17 }
  0x4d   :  { %426 = vperm.xlu2 %578, %v336_v24  }
  0x54   :  { %160 = vmatmul.f32.gmra.mxu2 %v86_v26  ;;  %136 = vmatmul.f32.gmra.mxu0 %v78_v27  ;;  %v187_v26 = vunpack.c.1.s8 %v173_v18  ;;  %v195_v27 = vcvt.s32.f32 %v179_v25 }
  0x5c   :  { %163 = vmatmul.f32.gmra.mxu2 %v87_v28  ;;  %139 = vmatmul.f32.gmra.mxu0 %v79_v29  ;;  %v203_v28 = vcvt.s32.f32 %v187_v26  ;;  %v180_v29 = vunpack.c.2.s8 %v171_v17 }
  0x64   :  { %166 = vmatmul.f32.gmra.mxu2 %v88_v30  ;;  %142 = vmatmul.f32.gmra.mxu0 %v80_v31  ;;  %v188_v30 = vunpack.c.2.s8 %v173_v18  ;;  %v196_v31 = vcvt.s32.f32 %v180_v29 }
  0xa9   :  { %v754_v33 = vpop.f32.mrf.mxu0 }
  0xaf   :  { %v146_v32 = vpop.f32.mrf.mxu2 }
  0xb1   :  { %v756_v35 = vpop.f32.mrf.mxu0 }
  0xb7   :  { %v149_v34 = vpop.f32.mrf.mxu2 }
  0xb9   :  { %v128_v37 = vpop.f32.mrf.mxu0 }
  0xbf   :  { %v152_v36 = vpop.f32.mrf.mxu2 }
  0xc1   :  { %v131_v39 = vpop.f32.mrf.mxu0 }
  0xc7   :  { %v155_v38 = vpop.f32.mrf.mxu2 }
  0xc9   :  { %v134_v42 = vpop.f32.mrf.mxu0 }
  0xcf   :  { %v158_v40 = vpop.f32.mrf.mxu2 }
  0xd1   :  { %v137_v46 = vpop.f32.mrf.mxu0 }
  0xd7   :  { %v161_v41 = vpop.f32.mrf.mxu2 }
  0xd9   :  { %v140_v49 = vpop.f32.mrf.mxu0 }
  0xdf   :  { %v164_v44 = vpop.f32.mrf.mxu2 }
  0xe1   :  { %v143_v52 = vpop.f32.mrf.mxu0 }
  0xe7   :  { %v167_v47 = vpop.f32.mrf.mxu2 }
  0xe8   :  { %222 = vmatpush.msra.mxu1 %v167_v47  ;;  %554 = vmatpush.msra.mxu3 %v167_v47 }
  0xea   :  { %223 = vmatpush.msra.mxu1 %v164_v44  ;;  %555 = vmatpush.msra.mxu3 %v164_v44 }
  0xec   :  { %224 = vmatpush.msra.mxu1 %v161_v41  ;;  %556 = vmatpush.msra.mxu3 %v161_v41 }
  0xee   :  { %225 = vmatpush.msra.mxu1 %v158_v40  ;;  %557 = vmatpush.msra.mxu3 %v158_v40 }
  0xf0   :  { %226 = vmatpush.msra.mxu1 %v155_v38  ;;  %558 = vmatpush.msra.mxu3 %v155_v38  ;;  %v810_v38 = vpop.permute.xlu2 %376 }
  0xf2   :  { %227 = vmatpush.msra.mxu1 %v152_v36  ;;  %559 = vmatpush.msra.mxu3 %v152_v36 }
  0xf4   :  { %228 = vmatpush.msra.mxu1 %v149_v34  ;;  %560 = vmatpush.msra.mxu3 %v149_v34  ;;  %v189_v34 = vunpack.c.3.s8 %v173_v18 }
  0xf6   :  { %229 = vmatpush.msra.mxu1 %v146_v32  ;;  %561 = vmatpush.msra.mxu3 %v146_v32  ;;  %v204_v32 = vcvt.s32.f32 %v188_v30  ;;  %v205_v36 = vcvt.s32.f32 %v189_v34 }
  0xf8   :  { %230 = vmatpush.msra.mxu1 %v143_v52  ;;  %562 = vmatpush.msra.mxu3 %v143_v52  ;;  %v812_v41 = vpop.permute.xlu2 %381 }
  0xfa   :  { %231 = vmatpush.msra.mxu1 %v140_v49  ;;  %563 = vmatpush.msra.mxu3 %v140_v49 }
  0xfc   :  { %232 = vmatpush.msra.mxu1 %v137_v46  ;;  %564 = vmatpush.msra.mxu3 %v137_v46 }
  0xfe   :  { %233 = vmatpush.msra.mxu1 %v134_v42  ;;  %565 = vmatpush.msra.mxu3 %v134_v42  ;;  %v817_v42 = vld [vmem:[%s856_s3] ss:$0 sm:$0xff]  ;;  %s663_s3 = smov [#allocation8]  }
  0xff   :  { %s522_s16 = sshll.u32 %s663_s3, 4  ;;  %s523_s16 = int_to_ptr.vmem [resolvable:$true] %s522_s16 }
 0x100   :  { %234 = vmatpush.msra.mxu1 %v131_v39  ;;  %566 = vmatpush.msra.mxu3 %v131_v39  ;;  %v367_v39 = vpop.permute.xlu1 %366  ;;  %v397_v48 = vpop.permute.xlu2 %396 }
 0x102   :  { %235 = vmatpush.msra.mxu1 %v128_v37  ;;  %567 = vmatpush.msra.mxu3 %v128_v37  ;;  %v357_v37 = vpop.permute.xlu0 %356 }
 0x104   :  { %236 = vmatpush.msra.mxu1 %v756_v35  ;;  %568 = vmatpush.msra.mxu3 %v756_v35 }
 0x106   :  { %237 = vmatpush.msra.mxu1 %v754_v33  ;;  %569 = vmatpush.msra.mxu3 %v754_v33  ;;  %v181_v33 = vunpack.c.3.s8 %v171_v17 }
 0x107   :  { %238 = vmatmul.f32.vlgmr.msra.gmra.mxu1 %v190_v62  ;;  %262 = vmatmul.f32.vlgmr.msra.gmra.mxu3 %v198_v63 }
 0x108   :  { %v197_v35 = vcvt.s32.f32 %v181_v33  ;;  %v372_v44 = vpop.permute.xlu1 %371  ;;  %v412_v19 = vpop.permute.xlu2 %411 }
 0x10a   :  { %v362_v40 = vpop.permute.xlu0 %361 }
 0x10f   :  { %241 = vmatmul.f32.gmra.mxu1 %v191_v5  ;;  %265 = vmatmul.f32.gmra.mxu3 %v199_v6 }
 0x110   :  { %v823_v56 = vpop.permute.xlu1 %391 }
 0x112   :  { %v820_v47 = vpop.permute.xlu0 %386 }
 0x117   :  { %244 = vmatmul.f32.gmra.mxu1 %v192_v11  ;;  %268 = vmatmul.f32.gmra.mxu3 %v200_v12 }
 0x118   :  { %v407_v6 = vpop.permute.xlu1 %406 }
 0x11a   :  { %v402_v61 = vpop.permute.xlu0 %401 }
 0x11f   :  { %247 = vmatmul.f32.gmra.mxu1 %v193_v15  ;;  %271 = vmatmul.f32.gmra.mxu3 %v201_v16 }
 0x122   :  { %v417_v30 = vpop.permute.xlu0 %416 }
 0x127   :  { %250 = vmatmul.f32.gmra.mxu1 %v194_v22  ;;  %274 = vmatmul.f32.gmra.mxu3 %v202_v23 }
 0x12f   :  { %253 = vmatmul.f32.gmra.mxu1 %v195_v27  ;;  %277 = vmatmul.f32.gmra.mxu3 %v203_v28 }
 0x137   :  { %256 = vmatmul.f32.gmra.mxu1 %v196_v31  ;;  %280 = vmatmul.f32.gmra.mxu3 %v204_v32 }
 0x13f   :  { %259 = vmatmul.f32.gmra.mxu1 %v197_v35  ;;  %283 = vmatmul.f32.gmra.mxu3 %v205_v36 }
 0x184   :  { %v239_v43 = vpop.f32.mrf.mxu1 }
 0x185   :  { %v434_v45 = vmul.f32 %v357_v37, %v239_v43 }
 0x187   :  { %v454_v46 = vadd.f32 %v817_v42, %v434_v45 }
 0x189   :  { %v470_v49 = vmax.f32 %v454_v46, 0.0 }
 0x18a   :  { %v263_v50 = vpop.f32.mrf.mxu3 }
 0x18b   :  { %v486_v51 = vmul.f32 %v470_v49, %v357_v37  ;;  %v442_v52 = vmul.f32 %v397_v48, %v263_v50 }
 0x18c   :  { %v242_v53 = vpop.f32.mrf.mxu1 }
 0x18d   :  { %502 = vst [vmem:[#allocation8] sm:$0xff] %v486_v51  ;;  %v462_v54 = vadd.f32 %v817_v42, %v442_v52  ;;  %v435_v55 = vmul.f32 %v362_v40, %v242_v53 }
 0x18f   :  { %v478_v57 = vmax.f32 %v462_v54, 0.0  ;;  %v455_v58 = vadd.f32 %v817_v42, %v435_v55  ;;  %v427_v55 = vpop.permute.xlu2 %426 }
 0x191   :  { %v494_v59 = vmul.f32 %v478_v57, %v397_v48  ;;  %v471_v60 = vmax.f32 %v455_v58, 0.0 }
 0x192   :  { %v266_v62 = vpop.f32.mrf.mxu3 }
 0x193   :  { %510 = vst [vmem:[#allocation8 + $0x40] sm:$0xff] %v494_v59  ;;  %v487_v63 = vmul.f32 %v471_v60, %v362_v40  ;;  %v443_v0 = vmul.f32 %v402_v61, %v266_v62 }
 0x194   :  { %v245_v1 = vpop.f32.mrf.mxu1 }
 0x195   :  { %503 = vst [vmem:[#allocation8 + $0x8] sm:$0xff] %v487_v63  ;;  %v463_v2 = vadd.f32 %v817_v42, %v443_v0  ;;  %v436_v3 = vmul.f32 %v367_v39, %v245_v1 }
 0x197   :  { %v479_v4 = vmax.f32 %v463_v2, 0.0  ;;  %v456_v5 = vadd.f32 %v817_v42, %v436_v3  ;;  %v432_v2 = vpop.permute.xlu0 %431 }
 0x199   :  { %v495_v7 = vmul.f32 %v479_v4, %v402_v61  ;;  %v472_v8 = vmax.f32 %v456_v5, 0.0 }
 0x19a   :  { %v269_v9 = vpop.f32.mrf.mxu3 }
 0x19b   :  { %511 = vst [vmem:[#allocation8 + $0x48] sm:$0xff] %v495_v7  ;;  %v488_v10 = vmul.f32 %v472_v8, %v367_v39  ;;  %v444_v11 = vmul.f32 %v407_v6, %v269_v9 }
 0x19c   :  { %v248_v12 = vpop.f32.mrf.mxu1 }
 0x19d   :  { %504 = vst [vmem:[#allocation8 + $0x10] sm:$0xff] %v488_v10  ;;  %v464_v13 = vadd.f32 %v817_v42, %v444_v11  ;;  %v437_v14 = vmul.f32 %v372_v44, %v248_v12 }
 0x19f   :  { %v480_v15 = vmax.f32 %v464_v13, 0.0  ;;  %v457_v16 = vadd.f32 %v817_v42, %v437_v14 }
 0x1a1   :  { %v496_v17 = vmul.f32 %v480_v15, %v407_v6  ;;  %v473_v18 = vmax.f32 %v457_v16, 0.0 }
 0x1a2   :  { %v272_v20 = vpop.f32.mrf.mxu3 }
 0x1a3   :  { %512 = vst [vmem:[#allocation8 + $0x50] sm:$0xff] %v496_v17  ;;  %v489_v21 = vmul.f32 %v473_v18, %v372_v44  ;;  %v445_v22 = vmul.f32 %v412_v19, %v272_v20  ;;  %v422_v44 = vpop.permute.xlu1 %421 }
 0x1a4   :  { %v251_v23 = vpop.f32.mrf.mxu1 }
 0x1a5   :  { %505 = vst [vmem:[#allocation8 + $0x18] sm:$0xff] %v489_v21  ;;  %v465_v24 = vadd.f32 %v817_v42, %v445_v22  ;;  %v438_v25 = vmul.f32 %v810_v38, %v251_v23 }
 0x1a7   :  { %v481_v26 = vmax.f32 %v465_v24, 0.0  ;;  %v458_v27 = vadd.f32 %v817_v42, %v438_v25 }
 0x1a9   :  { %v497_v28 = vmul.f32 %v481_v26, %v412_v19  ;;  %v474_v29 = vmax.f32 %v458_v27, 0.0 }
 0x1aa   :  { %v275_v31 = vpop.f32.mrf.mxu3 }
 0x1ab   :  { %513 = vst [vmem:[#allocation8 + $0x58] sm:$0xff] %v497_v28  ;;  %v490_v32 = vmul.f32 %v474_v29, %v810_v38  ;;  %v446_v33 = vmul.f32 %v417_v30, %v275_v31 }
 0x1ac   :  { %v254_v34 = vpop.f32.mrf.mxu1 }
 0x1ad   :  { %506 = vst [vmem:[#allocation8 + $0x20] sm:$0xff] %v490_v32  ;;  %v466_v35 = vadd.f32 %v817_v42, %v446_v33  ;;  %v439_v36 = vmul.f32 %v812_v41, %v254_v34 }
 0x1af   :  { %v482_v37 = vmax.f32 %v466_v35, 0.0  ;;  %v459_v39 = vadd.f32 %v817_v42, %v439_v36 }
 0x1b1   :  { %v498_v40 = vmul.f32 %v482_v37, %v417_v30  ;;  %v475_v43 = vmax.f32 %v459_v39, 0.0 }
 0x1b2   :  { %v278_v45 = vpop.f32.mrf.mxu3 }
 0x1b3   :  { %514 = vst [vmem:[#allocation8 + $0x60] sm:$0xff] %v498_v40  ;;  %v491_v46 = vmul.f32 %v475_v43, %v812_v41  ;;  %v447_v48 = vmul.f32 %v422_v44, %v278_v45 }
 0x1b4   :  { %v257_v49 = vpop.f32.mrf.mxu1 }
 0x1b5   :  { %507 = vst [vmem:[#allocation8 + $0x28] sm:$0xff] %v491_v46  ;;  %v467_v38 = vadd.f32 %v817_v42, %v447_v48  ;;  %v440_v50 = vmul.f32 %v820_v47, %v257_v49 }
 0x1b7   :  { %v483_v51 = vmax.f32 %v467_v38, 0.0  ;;  %v460_v52 = vadd.f32 %v817_v42, %v440_v50 }
 0x1b9   :  { %v499_v53 = vmul.f32 %v483_v51, %v422_v44  ;;  %v476_v54 = vmax.f32 %v460_v52, 0.0 }
 0x1ba   :  { %v281_v57 = vpop.f32.mrf.mxu3 }
 0x1bb   :  { %515 = vst [vmem:[#allocation8 + $0x68] sm:$0xff] %v499_v53  ;;  %v492_v58 = vmul.f32 %v476_v54, %v820_v47  ;;  %v448_v59 = vmul.f32 %v427_v55, %v281_v57 }
 0x1bc   :  { %v260_v60 = vpop.f32.mrf.mxu1 }
 0x1bd   :  { %508 = vst [vmem:[#allocation8 + $0x30] sm:$0xff] %v492_v58  ;;  %v468_v41 = vadd.f32 %v817_v42, %v448_v59  ;;  %v441_v61 = vmul.f32 %v823_v56, %v260_v60 }
 0x1bf   :  { %v484_v62 = vmax.f32 %v468_v41, 0.0  ;;  %v461_v63 = vadd.f32 %v817_v42, %v441_v61 }
 0x1c1   :  { %v500_v0 = vmul.f32 %v484_v62, %v427_v55  ;;  %v477_v1 = vmax.f32 %v461_v63, 0.0 }
 0x1c2   :  { %v284_v3 = vpop.f32.mrf.mxu3 }
 0x1c3   :  { %516 = vst [vmem:[#allocation8 + $0x70] sm:$0xff] %v500_v0  ;;  %v493_v4 = vmul.f32 %v477_v1, %v823_v56  ;;  %v449_v5 = vmul.f32 %v432_v2, %v284_v3 }
 0x1c5   :  { %509 = vst [vmem:[#allocation8 + $0x38] sm:$0xff] %v493_v4  ;;  %v469_v47 = vadd.f32 %v817_v42, %v449_v5 }
 0x1c7   :  { %v485_v6 = vmax.f32 %v469_v47, 0.0 }
 0x1c9   :  { %v501_v7 = vmul.f32 %v485_v6, %v432_v2 }
 0x1cb   :  { %517 = vst [vmem:[#allocation8 + $0x78] sm:$0xff] %v501_v7 }
 0x1cc   :  { %530 = dma.vmem_to_hbm [thread:$0]  %s523_s16, 2048, %s525_s19, [#allocation5], %s659_s26, %s659_s26, %s660_s27  }
 0x1cd   :  { %656 = dma.done.wait [#allocation5], 2048  }
 0x1ce   :  { %657 = vsyncadd [#allocation5], 4294965248 }
 0x1cf   :  { %535 = vsyncpa [#allocation4], 1 }
 0x1d0   :  { %536 = vsyncpa [#allocation7], 1 }
 0x1d1   :  { %537 = vsyncpa [#allocation5], 1 }

</bundles_post_ra>
